<compile_context>
chip_gen: v5e
topology: v5e:2x2
jax: 0.10.0
libtpu: 0.0.40
codegen_flags: <defaults>
</compile_context>

<pallas_src>
import jax
import jax.numpy as jnp
from jax.experimental import pallas as pl
from jax.experimental.pallas import tpu as pltpu


_LEAKY_SLOPE = 0.1


def _round_up(n, m):
    return ((n + m - 1) // m) * m


def _mlp_kernel(x_ref, w1_ref, b1_ref, w2_ref, b2_ref, w3_ref, b3_ref, o_ref):
    slope = jnp.float32(_LEAKY_SLOPE)

    # f32 tile from HBM; cast to the matmul dtype in-kernel (VALU slack, free).
    x = x_ref[...].astype(w1_ref.dtype)

    # hidden[0]: Linear(num_inputs, num_hidden) + LeakyReLU(0.1)
    # bf16 operands on the MXU, f32 accumulation; elementwise math in f32.
    h1 = jnp.dot(x, w1_ref[...], preferred_element_type=jnp.float32) + b1_ref[...]
    h1 = jnp.maximum(h1, slope * h1)

    # hidden[2]: Linear(num_hidden, num_hidden), then the outer LeakyReLU(0.1)
    h2 = jnp.dot(h1.astype(w2_ref.dtype), w2_ref[...],
                 preferred_element_type=jnp.float32) + b2_ref[...]
    h2 = jnp.maximum(h2, slope * h2)

    # output: Linear(num_hidden, num_outputs_padded); lane-dense, O padded to a
    # multiple of 128 by the wrapper (extra columns are zeros).  Store bf16.
    out = jnp.dot(h2.astype(w3_ref.dtype), w3_ref[...],
                  preferred_element_type=jnp.float32) + b3_ref[...]
    o_ref[...] = out.astype(o_ref.dtype)


def _choose_tile_b(B, tile_b_cap):
    """Pick a batch tile: multiple of 16, <= cap, never inflating tiny batches,
    and giving >= 2 grid steps whenever the (padded) batch has >= 32 rows."""
    rows = _round_up(max(B, 1), 16)
    cap = max(16, _round_up(min(tile_b_cap, 1024), 16))
    if rows >= 32:
        half = max(16, (rows // 2) // 16 * 16)  # largest mult-of-16 <= rows/2
        tile = min(cap, half)
    else:
        tile = 16
    return tile, _round_up(rows, tile)


def mlp_forward(x, params, *, tile_b=1024, matmul_dtype=jnp.bfloat16,
                store_dtype=jnp.bfloat16):
    """Run the fused MLP kernel.

    x: (B, num_inputs) float32
    params: dict with w1 (I,H), b1 (1,H), w2 (H,H), b2 (1,H), w3 (H,O), b3 (1,O)
    """
    w1, b1 = params["w1"], params["b1"]
    w2, b2 = params["w2"], params["b2"]
    w3, b3 = params["w3"], params["b3"]

    B, I = x.shape
    H = w1.shape[1]
    O = w3.shape[1]

    tile_b, B_pad = _choose_tile_b(B, tile_b)
    grid = (B_pad // tile_b,)

    # Lane-dense output: pad O up to a multiple of 128 (full lane width).
    O_pad = _round_up(max(O, 128), 128)

    mm_dt = jnp.dtype(matmul_dtype)
    st_dt = jnp.dtype(store_dtype)
    mm_sz = mm_dt.itemsize
    st_sz = st_dt.itemsize

    # x stays f32 (no wrapper cast pass); pad batch rows only if needed.
    x_p = x if B_pad == B else jnp.pad(x, ((0, B_pad - B), (0, 0)))

    # Weights: one-time cast to the matmul dtype; biases stay f32.
    w1_p = w1.astype(mm_dt)
    w2_p = w2.astype(mm_dt)
    w3_p = w3.astype(mm_dt)
    b1_p, b2_p, b3_p = b1, b2, b3
    if O_pad != O:
        w3_p = jnp.pad(w3_p, ((0, 0), (0, O_pad - O)))
        b3_p = jnp.pad(b3_p, ((0, 0), (0, O_pad - O)))

    # --- VMEM budget (honest: tiles double-buffered, resident weights,
    # f32 intermediates), capped with headroom for compiler scratch. ---
    weight_bytes = ((I * H + H * H + H * O_pad) * mm_sz
                    + (H + H + O_pad) * 4)
    est = (2 * tile_b * I * 4            # x tiles (f32, double-buffered)
           + 2 * tile_b * O_pad * st_sz  # out tiles (double-buffered)
           + 2 * weight_bytes            # weights/biases (default 2x buffers)
           + 2 * tile_b * H * 4          # h1, h2 f32 intermediates
           + tile_b * O_pad * 4)         # f32 out before the store cast
    try:
        vmem_cap = pltpu.get_tpu_info().vmem_capacity_bytes
    except Exception:
        vmem_cap = 64 << 20
    cap = max(16 << 20, min(vmem_cap - (16 << 20), 48 << 20))
    vmem_bytes = max(1 << 20, min(est + (4 << 20), cap))

    # Advisory cost estimate (this shape is overhead/DMA-bound, not MXU-bound).
    flops = 2 * B_pad * (I * H + H * H + H * O_pad)
    bytes_accessed = (B_pad * I * 4 + weight_bytes + B_pad * O_pad * st_sz)
    cost = pl.CostEstimate(flops=flops, transcendentals=0,
                           bytes_accessed=bytes_accessed)

    out = pl.pallas_call(
        _mlp_kernel,
        out_shape=jax.ShapeDtypeStruct((B_pad, O_pad), st_dt),
        grid=grid,
        in_specs=[
            pl.BlockSpec((tile_b, I), lambda i: (i, 0)),   # x tile (f32)
            pl.BlockSpec((I, H), lambda i: (0, 0)),        # w1 (resident)
            pl.BlockSpec((1, H), lambda i: (0, 0)),        # b1
            pl.BlockSpec((H, H), lambda i: (0, 0)),        # w2
            pl.BlockSpec((1, H), lambda i: (0, 0)),        # b2
            pl.BlockSpec((H, O_pad), lambda i: (0, 0)),    # w3 (padded)
            pl.BlockSpec((1, O_pad), lambda i: (0, 0)),    # b3 (padded)
        ],
        out_specs=pl.BlockSpec((tile_b, O_pad), lambda i: (i, 0)),
        compiler_params=pltpu.CompilerParams(
            dimension_semantics=("parallel",),
            vmem_limit_bytes=vmem_bytes,
        ),
        cost_estimate=cost,
    )(x_p, w1_p, b1_p, w2_p, b2_p, w3_p, b3_p)

    # Slice off batch / output-lane padding.
    return out[:B, :O].astype(x.dtype)


def init_params(key, num_inputs, num_outputs, num_hidden):
    """Deterministic parameter init (uniform, roughly PyTorch-Linear-like)."""
    ks = jax.random.split(key, 6)

    def lin(kw, kb, fan_in, fan_out):
        bound = 1.0 / jnp.sqrt(jnp.float32(fan_in))
        w = jax.random.uniform(kw, (fan_in, fan_out), jnp.float32, -bound, bound)
        b = jax.random.uniform(kb, (1, fan_out), jnp.float32, -bound, bound)
        return w, b

    w1, b1 = lin(ks[0], ks[1], num_inputs, num_hidden)
    w2, b2 = lin(ks[2], ks[3], num_hidden, num_hidden)
    w3, b3 = lin(ks[4], ks[5], num_hidden, num_outputs)
    return {"w1": w1, "b1": b1, "w2": w2, "b2": b2, "w3": w3, "b3": b3}


def _reference_matched(x, p, matmul_dtype=jnp.bfloat16, store_dtype=jnp.bfloat16):
    """Plain-JAX reference with the same numerics as the kernel (bf16 matmul
    operands, f32 accumulation, f32 LeakyReLU, bf16 output store)."""
    dt = jnp.dtype(matmul_dtype)

    def lrelu(v):
        return jnp.maximum(v, _LEAKY_SLOPE * v)

    h = jnp.dot(x.astype(dt), p["w1"].astype(dt),
                preferred_element_type=jnp.float32) + p["b1"]
    h = lrelu(h)
    h = jnp.dot(h.astype(dt), p["w2"].astype(dt),
                preferred_element_type=jnp.float32) + p["b2"]
    h = lrelu(h)
    out = jnp.dot(h.astype(dt), p["w3"].astype(dt),
                  preferred_element_type=jnp.float32) + p["b3"]
    return out.astype(store_dtype).astype(x.dtype)


if __name__ == "__main__":
    num_inputs, num_hidden, num_outputs = 32, 128, 16
    batch = 8

    key = jax.random.PRNGKey(0)
    kx, kp = jax.random.split(key)
    x = jax.random.normal(kx, (batch, num_inputs), jnp.float32)
    params = init_params(kp, num_inputs, num_outputs, num_hidden)

    out = mlp_forward(x, params)
    jax.block_until_ready(out)

    ref = _reference_matched(x, params)
    assert out.shape == (batch, num_outputs), out.shape
    assert jnp.allclose(out, ref, atol=1e-2, rtol=2e-2), (
        "mismatch vs matched-precision reference: "
        f"max abs diff = {float(jnp.max(jnp.abs(out - ref)))}"
    )

    print("KERNEL_OK")
</pallas_src>

<mosaic_0001>
module attributes {stable_mosaic.version = 11 : i64} {
  func.func @_mlp_kernel(%arg0: i32, %arg1: memref<16x32xf32, #tpu.memory_space<vmem>>, %arg2: memref<32x128xbf16, #tpu.memory_space<vmem>>, %arg3: memref<1x128xf32, #tpu.memory_space<vmem>>, %arg4: memref<128x128xbf16, #tpu.memory_space<vmem>>, %arg5: memref<1x128xf32, #tpu.memory_space<vmem>>, %arg6: memref<128x128xbf16, #tpu.memory_space<vmem>>, %arg7: memref<1x128xf32, #tpu.memory_space<vmem>>, %arg8: memref<16x128xbf16, #tpu.memory_space<vmem>>) attributes {dimension_semantics = [#tpu.dimension_semantics<parallel>], iteration_bounds = array<i64: 1>, scalar_prefetch = 0 : i64, scratch_operands = 0 : i64, tpu.core_type = #tpu.core_type<tc>, window_params = [{transform_indices = @transform_0, window_bounds = array<i64: 16, 32>}, {pipeline_mode = #tpu.pipeline_mode<synchronous>, transform_indices = @transform_1, window_bounds = array<i64: 32, 128>}, {pipeline_mode = #tpu.pipeline_mode<synchronous>, transform_indices = @transform_2, window_bounds = array<i64: 1, 128>}, {pipeline_mode = #tpu.pipeline_mode<synchronous>, transform_indices = @transform_3, window_bounds = array<i64: 128, 128>}, {pipeline_mode = #tpu.pipeline_mode<synchronous>, transform_indices = @transform_4, window_bounds = array<i64: 1, 128>}, {pipeline_mode = #tpu.pipeline_mode<synchronous>, transform_indices = @transform_5, window_bounds = array<i64: 128, 128>}, {pipeline_mode = #tpu.pipeline_mode<synchronous>, transform_indices = @transform_6, window_bounds = array<i64: 1, 128>}, {transform_indices = @transform_7, window_bounds = array<i64: 16, 128>}]} {
    %c0 = arith.constant 0 : index
    %c0_0 = arith.constant 0 : index
    %0 = vector.load %arg1[%c0, %c0_0] : memref<16x32xf32, #tpu.memory_space<vmem>>, vector<16x32xf32>
    %1 = arith.truncf %0 : vector<16x32xf32> to vector<16x32xbf16>
    %c0_1 = arith.constant 0 : index
    %c0_2 = arith.constant 0 : index
    %2 = vector.load %arg2[%c0_1, %c0_2] : memref<32x128xbf16, #tpu.memory_space<vmem>>, vector<32x128xbf16>
    %cst = arith.constant dense<0.000000e+00> : vector<16x128xf32>
    %3 = tpu.matmul %1, %2, %cst {dimension_numbers = #tpu.dot_dimension_numbers<[1], [0], [0], [1], [0, 0, 1, 1], [], []>} : vector<16x32xbf16>, vector<32x128xbf16>, vector<16x128xf32> -> vector<16x128xf32>
    %c0_3 = arith.constant 0 : index
    %c0_4 = arith.constant 0 : index
    %4 = vector.load %arg3[%c0_3, %c0_4] : memref<1x128xf32, #tpu.memory_space<vmem>>, vector<1x128xf32>
    %5 = vector.broadcast %4 : vector<1x128xf32> to vector<16x128xf32>
    %6 = arith.addf %3, %5 : vector<16x128xf32>
    %cst_5 = arith.constant 1.000000e-01 : f32
    %7 = vector.broadcast %cst_5 : f32 to vector<16x128xf32>
    %8 = arith.mulf %7, %6 : vector<16x128xf32>
    %9 = arith.maximumf %6, %8 : vector<16x128xf32>
    %10 = arith.truncf %9 : vector<16x128xf32> to vector<16x128xbf16>
    %c0_6 = arith.constant 0 : index
    %c0_7 = arith.constant 0 : index
    %11 = vector.load %arg4[%c0_6, %c0_7] : memref<128x128xbf16, #tpu.memory_space<vmem>>, vector<128x128xbf16>
    %cst_8 = arith.constant dense<0.000000e+00> : vector<16x128xf32>
    %12 = tpu.matmul %10, %11, %cst_8 {dimension_numbers = #tpu.dot_dimension_numbers<[1], [0], [0], [1], [0, 0, 1, 1], [], []>} : vector<16x128xbf16>, vector<128x128xbf16>, vector<16x128xf32> -> vector<16x128xf32>
    %c0_9 = arith.constant 0 : index
    %c0_10 = arith.constant 0 : index
    %13 = vector.load %arg5[%c0_9, %c0_10] : memref<1x128xf32, #tpu.memory_space<vmem>>, vector<1x128xf32>
    %14 = vector.broadcast %13 : vector<1x128xf32> to vector<16x128xf32>
    %15 = arith.addf %12, %14 : vector<16x128xf32>
    %cst_11 = arith.constant 1.000000e-01 : f32
    %16 = vector.broadcast %cst_11 : f32 to vector<16x128xf32>
    %17 = arith.mulf %16, %15 : vector<16x128xf32>
    %18 = arith.maximumf %15, %17 : vector<16x128xf32>
    %19 = arith.truncf %18 : vector<16x128xf32> to vector<16x128xbf16>
    %c0_12 = arith.constant 0 : index
    %c0_13 = arith.constant 0 : index
    %20 = vector.load %arg6[%c0_12, %c0_13] : memref<128x128xbf16, #tpu.memory_space<vmem>>, vector<128x128xbf16>
    %cst_14 = arith.constant dense<0.000000e+00> : vector<16x128xf32>
    %21 = tpu.matmul %19, %20, %cst_14 {dimension_numbers = #tpu.dot_dimension_numbers<[1], [0], [0], [1], [0, 0, 1, 1], [], []>} : vector<16x128xbf16>, vector<128x128xbf16>, vector<16x128xf32> -> vector<16x128xf32>
    %c0_15 = arith.constant 0 : index
    %c0_16 = arith.constant 0 : index
    %22 = vector.load %arg7[%c0_15, %c0_16] : memref<1x128xf32, #tpu.memory_space<vmem>>, vector<1x128xf32>
    %23 = vector.broadcast %22 : vector<1x128xf32> to vector<16x128xf32>
    %24 = arith.addf %21, %23 : vector<16x128xf32>
    %25 = arith.truncf %24 : vector<16x128xf32> to vector<16x128xbf16>
    %c0_17 = arith.constant 0 : index
    %c0_18 = arith.constant 0 : index
    %26 = vector.load %arg8[%c0_17, %c0_18] : memref<16x128xbf16, #tpu.memory_space<vmem>>, vector<16x128xbf16>
    tpu.vector_store %arg8[%c0_17, %c0_18], %25 {strides = array<i32>} : memref<16x128xbf16, #tpu.memory_space<vmem>>, vector<16x128xbf16>,
    return
  }
  func.func @transform_0(%arg0: i32) -> (i32, i32) {
    %c0_i32 = arith.constant 0 : i32
    %c0_i32_0 = arith.constant 0 : i32
    return %arg0, %c0_i32 : i32, i32
  }
  func.func @transform_1(%arg0: i32) -> (i32, i32) {
    %c0_i32 = arith.constant 0 : i32
    %c0_i32_0 = arith.constant 0 : i32
    %c0_i32_1 = arith.constant 0 : i32
    return %c0_i32, %c0_i32_0 : i32, i32
  }
  func.func @transform_2(%arg0: i32) -> (i32, i32) {
    %c0_i32 = arith.constant 0 : i32
    %c0_i32_0 = arith.constant 0 : i32
    %c0_i32_1 = arith.constant 0 : i32
    return %c0_i32, %c0_i32_0 : i32, i32
  }
  func.func @transform_3(%arg0: i32) -> (i32, i32) {
    %c0_i32 = arith.constant 0 : i32
    %c0_i32_0 = arith.constant 0 : i32
    %c0_i32_1 = arith.constant 0 : i32
    return %c0_i32, %c0_i32_0 : i32, i32
  }
  func.func @transform_4(%arg0: i32) -> (i32, i32) {
    %c0_i32 = arith.constant 0 : i32
    %c0_i32_0 = arith.constant 0 : i32
    %c0_i32_1 = arith.constant 0 : i32
    return %c0_i32, %c0_i32_0 : i32, i32
  }
  func.func @transform_5(%arg0: i32) -> (i32, i32) {
    %c0_i32 = arith.constant 0 : i32
    %c0_i32_0 = arith.constant 0 : i32
    %c0_i32_1 = arith.constant 0 : i32
    return %c0_i32, %c0_i32_0 : i32, i32
  }
  func.func @transform_6(%arg0: i32) -> (i32, i32) {
    %c0_i32 = arith.constant 0 : i32
    %c0_i32_0 = arith.constant 0 : i32
    %c0_i32_1 = arith.constant 0 : i32
    return %c0_i32, %c0_i32_0 : i32, i32
  }
  func.func @transform_7(%arg0: i32) -> (i32, i32) {
    %c0_i32 = arith.constant 0 : i32
    %c0_i32_0 = arith.constant 0 : i32
    return %arg0, %c0_i32 : i32, i32
  }
}

</mosaic_0001>

<bundles_post_ra>
// kernel: tpu_custom_call.1
= control target key start
LH: loop header
LB: loop body
LE: loop exit
PB: predicated region body
PF: predicated region fallthrough
CT: control target
= control target key end

     0   :  { %12 = vsyncpa [#allocation3], 0  ;;  %s652_s0 = inlined_call_operand.hbm [shape: f32[16,32], index: 0, kind: input, shape index: {}]   ;;  %s653_s1 = inlined_call_operand.hbm [shape: bf16[32,128], index: 1, kind: input, shape index: {}]   ;;  %s654_s2 = inlined_call_operand.vmem [shape: f32[1,128], index: 2, kind: input, shape index: {}]   ;;  %s655_s3 = inlined_call_operand.hbm [shape: bf16[128,128], index: 3, kind: input, shape index: {}]   ;;  %s656_s4 = inlined_call_operand.vmem [shape: f32[1,128], index: 4, kind: input, shape index: {}]   ;;  %s657_s5 = inlined_call_operand.hbm [shape: bf16[128,128], index: 5, kind: input, shape index: {}]   ;;  %s658_s6 = inlined_call_operand.vmem [shape: f32[1,128], index: 6, kind: input, shape index: {}]   ;;  %s659_s7 = inlined_call_operand.hbm [shape: bf16[16,128], index: 7, kind: output, shape index: {}]  }
   0x1   :  { %13 = vsyncpa [#allocation6], 0 }
   0x2   :  { %14 = vsyncpa [#allocation9], 0  ;;  %s33_s26 = sshll.u32 %s653_s1, 4  ;;  %s34_s26 = int_to_ptr.hbm [resolvable:$true] %s33_s26 }
   0x3   :  { %15 = vsyncpa [#allocation4], 0  ;;  %s567_s27 = smov [#allocation5]   ;;  %s20_s8 = sshll.u32 %s652_s0, 4  ;;  %s21_s8 = int_to_ptr.hbm [resolvable:$true] %s20_s8 }
   0x4   :  { %s35_s28 = sshll.u32 %s567_s27, 4  ;;  %s568_s9 = smov 64   ;;  %s36_s28 = int_to_ptr.vmem [resolvable:$true] %s35_s28 }
   0x5   :  { %s569_s10 = smov 4   ;;  %s570_s11 = smov [#allocation2]  }
   0x6   :  { %41 = dma.hbm_to_vmem [thread:$0]  %s34_s26, 256, %s36_s28, [#allocation6], %s568_s9, %s568_s9, %s569_s10  }
   0x7   :  { %s22_s12 = sshll.u32 %s570_s11, 4  ;;  %s571_s1 = smov 128   ;;  %s23_s12 = int_to_ptr.vmem [resolvable:$true] %s22_s12 }
   0x8   :  { %s572_s13 = smov 8   ;;  %s48_s16 = sshll.u32 %s655_s3, 4  ;;  %s49_s16 = int_to_ptr.hbm [resolvable:$true] %s48_s16 }
   0x9   :  { %28 = dma.hbm_to_vmem [thread:$0]  %s21_s8, 256, %s23_s12, [#allocation3], %s571_s1, %s571_s1, %s572_s13  }
   0xa   :  { %s573_s17 = smov [#allocation7]   ;;  %s63_s20 = sshll.u32 %s657_s5, 4  ;;  %s64_s20 = int_to_ptr.hbm [resolvable:$true] %s63_s20 }
   0xb   :  { %s50_s0 = sshll.u32 %s573_s17, 4  ;;  %s574_s21 = smov [#allocation8]   ;;  %s51_s0 = int_to_ptr.vmem [resolvable:$true] %s50_s0 }
   0xc   :  { %56 = dma.hbm_to_vmem [thread:$0]  %s49_s16, 1024, %s51_s0, [#allocation6], %s568_s9, %s568_s9, %s569_s10  }
   0xd   :  { %s65_s22 = sshll.u32 %s574_s21, 4  ;;  %s66_s22 = int_to_ptr.vmem [resolvable:$true] %s65_s22 }
   0xe   :  { %71 = dma.hbm_to_vmem [thread:$0]  %s64_s20, 1024, %s66_s22, [#allocation9], %s568_s9, %s568_s9, %s569_s10  }
   0xf   :  { %559 = dma.done.wait [#allocation3], 256  }
  0x10   :  { %560 = vsyncadd [#allocation3], 4294967040 }
  0x11   :  { %561 = dma.done.wait [#allocation6], 1280  }
  0x12   :  { %562 = vsyncadd [#allocation6], 4294966016 }
  0x13   :  { %563 = dma.done.wait [#allocation9], 1024  }
  0x14   :  { %564 = vsyncadd [#allocation9], 4294966272  ;;  %v405_v0 = vld [vmem:[#allocation5 + $0x8] sm:$0xff]  ;;  %v404_v1 = vld [vmem:[#allocation5] sm:$0xff]  ;;  %vm114_vm0 = vcmask 261120   ;;  %s575_s26 = smov [#allocation10]  }
  0x15   :  { %v413_v2 = vld [vmem:[#allocation7 + $0x38] sm:$0xff]  ;;  %124 = vmatpush.bf16.msra.mxu0 %v405_v0  ;;  %v91_v3 = vld [vmem:[#allocation2] sm:$0xff]  ;;  %v92_v4 = vld [vmem:[#allocation2 + $0x8] sm:$0xff]  ;;  %s314_s27 = sshll.u32 %s575_s26, 4  ;;  %s315_s27 = int_to_ptr.vmem [resolvable:$true] %s314_s27 }
  0x16   :  { %205 = vmatpush.bf16.msra.mxu1 %v413_v2  ;;  %v412_v5 = vld [vmem:[#allocation7 + $0x30] sm:$0xff]  ;;  %v93_v6 = vpack.c.bf16 %v92_v4, %v91_v3  ;;  %v411_v7 = vld [vmem:[#allocation7 + $0x28] sm:$0xff]  ;;  %v410_v8 = vld [vmem:[#allocation7 + $0x20] sm:$0xff] }
  0x17   :  { %v409_v9 = vld [vmem:[#allocation7 + $0x18] sm:$0xff]  ;;  %v408_v10 = vld [vmem:[#allocation7 + $0x10] sm:$0xff]  ;;  %v407_v11 = vld [vmem:[#allocation7 + $0x8] sm:$0xff] }
  0x18   :  { %v406_v12 = vld [vmem:[#allocation7] sm:$0xff]  ;;  %v421_v13 = vld [vmem:[#allocation8 + $0x38] sm:$0xff]  ;;  %v420_v14 = vld [vmem:[#allocation8 + $0x30] sm:$0xff] }
  0x19   :  { %125 = vmatpush.bf16.msra.mxu0 %v404_v1  ;;  %292 = vmatpush.bf16.msra.mxu2 %v421_v13  ;;  %v419_v15 = vld [vmem:[#allocation8 + $0x28] sm:$0xff]  ;;  %v418_v16 = vld [vmem:[#allocation8 + $0x20] sm:$0xff]  ;;  %v417_v27 = vld [vmem:[#allocation8 + $0x18] sm:$0xff] }
  0x1a   :  { %206 = vmatpush.bf16.msra.mxu1 %v412_v5  ;;  %v436_v18 = vld [vmem:[%s654_s2] ss:$0 sm:$0xff]  ;;  %v416_v28 = vld [vmem:[#allocation8 + $0x10] sm:$0xff]  ;;  %v415_v29 = vld [vmem:[#allocation8 + $0x8] sm:$0xff] }
  0x1b   :  { %v414_v30 = vld [vmem:[#allocation8] sm:$0xff] }
  0x1c   :  { %339 = vmatmul.msk.bf16.vlgmr.msra.gmra.mxu0 %vm114_vm0, %v93_v6  ;;  %v437_v32 = vld [vmem:[%s656_s4] ss:$0 sm:$0xff]  ;;  %s316_s4 = sshll.u32 %s659_s7, 4  ;;  %s317_s4 = int_to_ptr.hbm [resolvable:$true] %s316_s4 }
  0x1d   :  { %293 = vmatpush.bf16.msra.mxu2 %v420_v14  ;;  %v438_v42 = vld [vmem:[%s658_s6] ss:$0 sm:$0xff] }
  0x1e   :  { %207 = vmatpush.bf16.msra.mxu1 %v411_v7 }
  0x21   :  { %294 = vmatpush.bf16.msra.mxu2 %v419_v15 }
  0x22   :  { %208 = vmatpush.bf16.msra.mxu1 %v410_v8 }
  0x25   :  { %295 = vmatpush.bf16.msra.mxu2 %v418_v16 }
  0x26   :  { %209 = vmatpush.bf16.msra.mxu1 %v409_v9 }
  0x29   :  { %296 = vmatpush.bf16.msra.mxu2 %v417_v27 }
  0x2a   :  { %210 = vmatpush.bf16.msra.mxu1 %v408_v10 }
  0x2d   :  { %297 = vmatpush.bf16.msra.mxu2 %v416_v28 }
  0x2e   :  { %211 = vmatpush.bf16.msra.mxu1 %v407_v11 }
  0x31   :  { %298 = vmatpush.bf16.msra.mxu2 %v415_v29 }
  0x32   :  { %212 = vmatpush.bf16.msra.mxu1 %v406_v12 }
  0x35   :  { %299 = vmatpush.bf16.msra.mxu2 %v414_v30 }
  0x99   :  { %v127_v17 = vpop.f32.mrf.mxu0 }
  0x9a   :  { %v128_v19 = vadd.f32 %v436_v18, %v127_v17 }
  0x9c   :  { %v132_v21 = vmul.f32 0.1, %v128_v19 }
  0x9e   :  { %v134_v24 = vmax.f32 %v128_v19, %v132_v21 }
  0xa1   :  { %v129_v20 = vpop.f32.mrf.mxu0 }
  0xa2   :  { %v130_v22 = vadd.f32 %v436_v18, %v129_v20 }
  0xa4   :  { %v133_v23 = vmul.f32 0.1, %v130_v22 }
  0xa6   :  { %v135_v25 = vmax.f32 %v130_v22, %v133_v23 }
  0xa8   :  { %v136_v26 = vpack.c.bf16 %v135_v25, %v134_v24 }
  0xaa   :  { %213 = vmatmul.bf16.vlgmr.msra.gmra.mxu1 %v136_v26 }
 0x127   :  { %v214_v31 = vpop.f32.mrf.mxu1 }
 0x128   :  { %v215_v33 = vadd.f32 %v437_v32, %v214_v31 }
 0x12a   :  { %v219_v35 = vmul.f32 0.1, %v215_v33 }
 0x12c   :  { %v221_v38 = vmax.f32 %v215_v33, %v219_v35 }
 0x12f   :  { %v216_v34 = vpop.f32.mrf.mxu1 }
 0x130   :  { %v217_v36 = vadd.f32 %v437_v32, %v216_v34 }
 0x132   :  { %v220_v37 = vmul.f32 0.1, %v217_v36 }
 0x134   :  { %v222_v39 = vmax.f32 %v217_v36, %v220_v37 }
 0x136   :  { %v223_v40 = vpack.c.bf16 %v222_v39, %v221_v38 }
 0x138   :  { %300 = vmatmul.bf16.vlgmr.msra.gmra.mxu2 %v223_v40 }
 0x1bb   :  { %v301_v41 = vpop.f32.mrf.mxu2 }
 0x1bc   :  { %v302_v44 = vadd.f32 %v438_v42, %v301_v41 }
 0x1c3   :  { %v303_v43 = vpop.f32.mrf.mxu2 }
 0x1c4   :  { %v304_v45 = vadd.f32 %v438_v42, %v303_v43 }
 0x1c6   :  { %v425_v46 = vpack.c.bf16 %v304_v45, %v302_v44 }
 0x1c8   :  { %426 = vst [vmem:[#allocation10] sm:$0xff] %v425_v46  }
 0x1c9   :  { %322 = dma.vmem_to_hbm [thread:$0]  %s315_s27, 128, %s317_s4, [#allocation4], %s568_s9, %s568_s9, %s569_s10  }
 0x1ca   :  { %565 = dma.done.wait [#allocation4], 128  }
 0x1cb   :  { %566 = vsyncadd [#allocation4], 4294967168 }
 0x1cc   :  { %327 = vsyncpa [#allocation3], 1 }
 0x1cd   :  { %328 = vsyncpa [#allocation6], 1 }
 0x1ce   :  { %329 = vsyncpa [#allocation9], 1 }
 0x1cf   :  { %330 = vsyncpa [#allocation4], 1 }

</bundles_post_ra>
